<compile_context>
chip_gen: v5e
topology: v5e:2x2
jax: 0.10.0
libtpu: 0.0.40
codegen_flags: <defaults>
</compile_context>

<pallas_src>
from functools import partial

import jax
import jax.numpy as jnp
from jax.experimental import pallas as pl
from jax.experimental.pallas import tpu as pltpu

K0 = 5      # conv0 kernel size (padding 2, depthwise)
KS = 7      # conv_spatial kernel size (dilation 3, padding 9, depthwise)
DIL = 3
PAD0 = 2    # conv0 padding
PADS = 9    # conv_spatial padding (== (KS // 2) * DIL -> "same" output length)

# Column offsets of the packed per-channel parameter row (see _pack_params).
_W0 = 0
_B0 = K0
_WS = K0 + 1
_BS = K0 + 1 + KS
_W1 = K0 + 2 + KS            # + input-channel index; b1 lives at _W1 + C


def _ddca_kernel(p_ref, x_ref, o_ref, *, L_valid):
    """One batch-row tile: block = (C, Bt, Lp) with Bt % 8 == 0, Lp % 128 == 0."""
    C, Bt, Lp = x_ref.shape

    # Lane mask: columns >= L_valid are the zero halo / padding region.
    lane = jax.lax.broadcasted_iota(jnp.int32, (Bt, Lp), 1)
    valid = lane < L_valid

    # Single DMA'd x block; per-channel (Bt, Lp) slabs reused for convs AND the gate.
    xs = [x_ref[c].astype(jnp.float32) for c in range(C)]

    # --- conv0: depthwise, kernel 5, zero padding 2 (cross-correlation) --------
    # out[l] = sum_k w0[k] * x[l + (k - PAD0)]  ->  shift = PAD0 - k (mod Lp).
    # Circular pltpu.roll is safe: the wrapper leaves >= PADS zero columns on the
    # right, so every wrapped / out-of-range read lands on zeros.
    a0 = []
    for c in range(C):
        xc = xs[c]
        acc = None
        for k in range(K0):
            sh = (PAD0 - k) % Lp
            xr = pltpu.roll(xc, shift=sh, axis=1) if sh else xc
            term = p_ref[c, _W0 + k] * xr
            acc = term if acc is None else acc + term
        acc = acc + p_ref[c, _B0]
        # Zero the halo so conv_spatial's taps see conv0's zero padding, not bias.
        a0.append(jnp.where(valid, acc, 0.0))

    # --- conv_spatial: depthwise, kernel 7, dilation 3, zero padding 9 ---------
    # out[l] = sum_j w[j] * a0[l + (j*DIL - PADS)]  ->  shift = PADS - j*DIL.
    # TODO(synk): on v6e/v7x the tap multiplies could be bf16-in / f32-accumulate
    # to halve VALU pressure (not on v5e: no bf16 VPU path).
    a1 = []
    for c in range(C):
        ac = a0[c]
        acc = None
        for j in range(KS):
            sh = (PADS - j * DIL) % Lp
            ar = pltpu.roll(ac, shift=sh, axis=1) if sh else ac
            term = p_ref[c, _WS + j] * ar
            acc = term if acc is None else acc + term
        a1.append(acc + p_ref[c, _BS])

    # --- conv1 (pointwise 1x1 channel mix) + gate u * attn ----------------------
    # C is tiny (4): C*C broadcast-FMAs on the VPU over fully dense vregs.
    # TODO(synk): for real model sizes (C >= ~64) fold (Bt, Lp) into the matmul N
    # dim and run jnp.dot(w1, acc2, preferred_element_type=f32) on the MXU.
    for oc in range(C):
        attn = None
        for ic in range(C):
            term = p_ref[oc, _W1 + ic] * a1[ic]
            attn = term if attn is None else attn + term
        attn = attn + p_ref[oc, _W1 + C]
        o_ref[oc] = (xs[oc] * attn).astype(o_ref.dtype)


def _round_up(a, m):
    return ((a + m - 1) // m) * m


def _pack_params(params):
    """Pack (w0, b0, wsp, bsp, w1, b1) into one (C, 15 + C) f32 row table."""
    w0, b0, wsp, bsp, w1, b1 = params
    C = w0.shape[0]
    return jnp.concatenate(
        [w0.reshape(C, K0), b0.reshape(C, 1),
         wsp.reshape(C, KS), bsp.reshape(C, 1),
         w1.reshape(C, C), b1.reshape(C, 1)], axis=1).astype(jnp.float32)


def _pick_batch_tile(Bp, C, Lp, vmem_budget_bytes=8 * 1024 * 1024):
    """Largest multiple-of-8 batch-row tile under a conservative live-VMEM budget.

    ~8 live f32 (row, Lp) slabs per channel per row: double-buffered x block,
    double-buffered out block, and the conv temporaries.  The 8 MiB live budget
    sits well inside the 32 MiB vmem_limit_bytes we request (and v7x's 64 MiB
    physical VMEM).  On v5e/v6e (single TensorCore) the biggest tile -> fewest
    grid steps; for large B the "parallel" axis still gets >= 2 steps so v7x's
    two TensorCores both get work.
    """
    per_row = 4 * C * Lp * 8
    cap = max(8, (vmem_budget_bytes // max(per_row, 1)) // 8 * 8)
    return min(Bp, cap)


@jax.jit
def ddca_forward(x, params):
    B, C, L = x.shape
    packed = _pack_params(params)

    # Lane/sublane-dense layout (layout plumbing only): (B, C, L) -> (C, Bp, Lp)
    # with Bp % 8 == 0 (sublanes), Lp % 128 == 0 (lanes) and Lp - L >= PADS so
    # circular rolls read the zero halo instead of wrapped data.
    # TODO(synk): for very long sequences, additionally tile L across the grid
    # with a +/-(PAD0 + PADS) halo instead of one full-Lp block per step.
    Lp = _round_up(L + PADS, 128)
    Bp = _round_up(B, 8)
    bt = _pick_batch_tile(Bp, C, Lp)
    Bp = _round_up(Bp, bt)
    nb = Bp // bt

    xt = jnp.transpose(x, (1, 0, 2))                        # (C, B, L)
    xt = jnp.pad(xt, ((0, 0), (0, Bp - B), (0, Lp - L)))    # zero rows / zero halo

    kernel = partial(_ddca_kernel, L_valid=L)

    out = pl.pallas_call(
        kernel,
        out_shape=jax.ShapeDtypeStruct((C, Bp, Lp), x.dtype),
        grid_spec=pltpu.PrefetchScalarGridSpec(
            num_scalar_prefetch=0,
            grid=(nb,),
            in_specs=[
                # One packed weight/bias table, SMEM-resident for the whole call.
                pl.BlockSpec(memory_space=pltpu.MemorySpace.SMEM),
                # x: one lane-dense block per grid step (single DMA per block).
                pl.BlockSpec((C, bt, Lp), lambda i: (0, i, 0)),
            ],
            out_specs=pl.BlockSpec((C, bt, Lp), lambda i: (0, i, 0)),
        ),
        compiler_params=pltpu.CompilerParams(
            dimension_semantics=("parallel",),
            vmem_limit_bytes=32 * 1024 * 1024,
        ),
    )(packed, xt)

    return jnp.transpose(out, (1, 0, 2))[:B, :, :L]


def ddca_reference(x, params):
    """Pure-JAX reference using lax convolutions (matches PyTorch semantics)."""
    w0, b0, wsp, bsp, w1, b1 = params
    C = x.shape[1]

    dn = jax.lax.conv_dimension_numbers(x.shape, (C, 1, K0), ('NCH', 'OIH', 'NCH'))
    a = jax.lax.conv_general_dilated(
        x, w0.reshape(C, 1, K0), window_strides=(1,), padding=[(PAD0, PAD0)],
        dimension_numbers=dn, feature_group_count=C)
    a = a + b0.reshape(1, C, 1)

    dn2 = jax.lax.conv_dimension_numbers(a.shape, (C, 1, KS), ('NCH', 'OIH', 'NCH'))
    a = jax.lax.conv_general_dilated(
        a, wsp.reshape(C, 1, KS), window_strides=(1,), padding=[(PADS, PADS)],
        rhs_dilation=(DIL,), dimension_numbers=dn2, feature_group_count=C)
    a = a + bsp.reshape(1, C, 1)

    attn = jnp.einsum('oc,bcl->bol', w1, a) + b1.reshape(1, C, 1)
    return x * attn


if __name__ == "__main__":
    B, C, L = 2, 4, 16   # dim = C = 4 channels, sequence length 16

    key = jax.random.PRNGKey(0)
    kx, k0, kb0, ks, kbs, k1, kb1 = jax.random.split(key, 7)

    x = jax.random.normal(kx, (B, C, L), dtype=jnp.float32)

    # Deterministic parameter init (shapes follow nn.Conv1d in DDCA.__init__).
    w0 = 0.1 * jax.random.normal(k0, (C, K0), dtype=jnp.float32)    # Conv1d(dim,dim,5,groups=dim)
    b0 = 0.1 * jax.random.normal(kb0, (C, 1), dtype=jnp.float32)
    wsp = 0.1 * jax.random.normal(ks, (C, KS), dtype=jnp.float32)   # Conv1d(dim,dim,7,dil=3,groups=dim)
    bsp = 0.1 * jax.random.normal(kbs, (C, 1), dtype=jnp.float32)
    w1 = 0.1 * jax.random.normal(k1, (C, C), dtype=jnp.float32)     # Conv1d(dim,dim,1)
    b1 = 0.1 * jax.random.normal(kb1, (C, 1), dtype=jnp.float32)

    params = (w0, b0, wsp, bsp, w1, b1)

    out = jax.block_until_ready(ddca_forward(x, params))
    ref = ddca_reference(x, params)

    assert out.shape == (B, C, L)
    assert jnp.allclose(out, ref, atol=1e-5, rtol=1e-5), "mismatch vs JAX reference"

    print("KERNEL_OK")
</pallas_src>

<mosaic_0001>
module attributes {stable_mosaic.version = 11 : i64} {
  func.func @_ddca_kernel(%arg0: i32, %arg1: memref<4x19xf32, #tpu.memory_space<smem>>, %arg2: memref<4x8x128xf32, #tpu.memory_space<vmem>>, %arg3: memref<4x8x128xf32, #tpu.memory_space<vmem>>) attributes {dimension_semantics = [#tpu.dimension_semantics<parallel>], iteration_bounds = array<i64: 1>, scalar_prefetch = 0 : i64, scratch_operands = 0 : i64, tpu.core_type = #tpu.core_type<tc>, window_params = [{transform_indices = @transform_0, window_bounds = array<i64: 4, 19>}, {transform_indices = @transform_1, window_bounds = array<i64: 4, 8, 128>}, {transform_indices = @transform_2, window_bounds = array<i64: 4, 8, 128>}]} {
    %0 = tpu.iota {dimensions = array<i32: 1>} : vector<8x128xi32>
    %c16_i32 = arith.constant 16 : i32
    %1 = vector.broadcast %c16_i32 : i32 to vector<8x128xi32>
    %2 = arith.cmpi slt, %0, %1 : vector<8x128xi32>
    %c0 = arith.constant 0 : index
    %c0_0 = arith.constant 0 : index
    %c0_1 = arith.constant 0 : index
    %3 = vector.load %arg2[%c0, %c0_0, %c0_1] : memref<4x8x128xf32, #tpu.memory_space<vmem>>, vector<1x8x128xf32>
    %4 = vector.shape_cast %3 : vector<1x8x128xf32> to vector<8x128xf32>
    %c1 = arith.constant 1 : index
    %c0_2 = arith.constant 0 : index
    %c0_3 = arith.constant 0 : index
    %5 = vector.load %arg2[%c1, %c0_2, %c0_3] : memref<4x8x128xf32, #tpu.memory_space<vmem>>, vector<1x8x128xf32>
    %6 = vector.shape_cast %5 : vector<1x8x128xf32> to vector<8x128xf32>
    %c2 = arith.constant 2 : index
    %c0_4 = arith.constant 0 : index
    %c0_5 = arith.constant 0 : index
    %7 = vector.load %arg2[%c2, %c0_4, %c0_5] : memref<4x8x128xf32, #tpu.memory_space<vmem>>, vector<1x8x128xf32>
    %8 = vector.shape_cast %7 : vector<1x8x128xf32> to vector<8x128xf32>
    %c3 = arith.constant 3 : index
    %c0_6 = arith.constant 0 : index
    %c0_7 = arith.constant 0 : index
    %9 = vector.load %arg2[%c3, %c0_6, %c0_7] : memref<4x8x128xf32, #tpu.memory_space<vmem>>, vector<1x8x128xf32>
    %10 = vector.shape_cast %9 : vector<1x8x128xf32> to vector<8x128xf32>
    %c2_i32 = arith.constant 2 : i32
    %11 = tpu.dynamic_rotate %4 by %c2_i32 dim 1 : vector<8x128xf32>, i32 -> vector<8x128xf32>
    %c0_8 = arith.constant 0 : index
    %c0_9 = arith.constant 0 : index
    %12 = memref.load %arg1[%c0_8, %c0_9] : memref<4x19xf32, #tpu.memory_space<smem>>
    %13 = vector.broadcast %12 : f32 to vector<8x128xf32>
    %14 = arith.mulf %13, %11 : vector<8x128xf32>
    %c1_i32 = arith.constant 1 : i32
    %15 = tpu.dynamic_rotate %4 by %c1_i32 dim 1 : vector<8x128xf32>, i32 -> vector<8x128xf32>
    %c0_10 = arith.constant 0 : index
    %c1_11 = arith.constant 1 : index
    %16 = memref.load %arg1[%c0_10, %c1_11] : memref<4x19xf32, #tpu.memory_space<smem>>
    %17 = vector.broadcast %16 : f32 to vector<8x128xf32>
    %18 = arith.mulf %17, %15 : vector<8x128xf32>
    %19 = arith.addf %14, %18 : vector<8x128xf32>
    %c0_12 = arith.constant 0 : index
    %c2_13 = arith.constant 2 : index
    %20 = memref.load %arg1[%c0_12, %c2_13] : memref<4x19xf32, #tpu.memory_space<smem>>
    %21 = vector.broadcast %20 : f32 to vector<8x128xf32>
    %22 = arith.mulf %21, %4 : vector<8x128xf32>
    %23 = arith.addf %19, %22 : vector<8x128xf32>
    %c127_i32 = arith.constant 127 : i32
    %24 = tpu.dynamic_rotate %4 by %c127_i32 dim 1 : vector<8x128xf32>, i32 -> vector<8x128xf32>
    %c0_14 = arith.constant 0 : index
    %c3_15 = arith.constant 3 : index
    %25 = memref.load %arg1[%c0_14, %c3_15] : memref<4x19xf32, #tpu.memory_space<smem>>
    %26 = vector.broadcast %25 : f32 to vector<8x128xf32>
    %27 = arith.mulf %26, %24 : vector<8x128xf32>
    %28 = arith.addf %23, %27 : vector<8x128xf32>
    %c126_i32 = arith.constant 126 : i32
    %29 = tpu.dynamic_rotate %4 by %c126_i32 dim 1 : vector<8x128xf32>, i32 -> vector<8x128xf32>
    %c0_16 = arith.constant 0 : index
    %c4 = arith.constant 4 : index
    %30 = memref.load %arg1[%c0_16, %c4] : memref<4x19xf32, #tpu.memory_space<smem>>
    %31 = vector.broadcast %30 : f32 to vector<8x128xf32>
    %32 = arith.mulf %31, %29 : vector<8x128xf32>
    %33 = arith.addf %28, %32 : vector<8x128xf32>
    %c0_17 = arith.constant 0 : index
    %c5 = arith.constant 5 : index
    %34 = memref.load %arg1[%c0_17, %c5] : memref<4x19xf32, #tpu.memory_space<smem>>
    %35 = vector.broadcast %34 : f32 to vector<8x128xf32>
    %36 = arith.addf %33, %35 : vector<8x128xf32>
    %cst = arith.constant 0.000000e+00 : f32
    %37 = vector.broadcast %cst : f32 to vector<8x128xf32>
    %38 = arith.select %2, %36, %37 : vector<8x128xi1>, vector<8x128xf32>
    %c2_i32_18 = arith.constant 2 : i32
    %39 = tpu.dynamic_rotate %6 by %c2_i32_18 dim 1 : vector<8x128xf32>, i32 -> vector<8x128xf32>
    %c1_19 = arith.constant 1 : index
    %c0_20 = arith.constant 0 : index
    %40 = memref.load %arg1[%c1_19, %c0_20] : memref<4x19xf32, #tpu.memory_space<smem>>
    %41 = vector.broadcast %40 : f32 to vector<8x128xf32>
    %42 = arith.mulf %41, %39 : vector<8x128xf32>
    %c1_i32_21 = arith.constant 1 : i32
    %43 = tpu.dynamic_rotate %6 by %c1_i32_21 dim 1 : vector<8x128xf32>, i32 -> vector<8x128xf32>
    %c1_22 = arith.constant 1 : index
    %c1_23 = arith.constant 1 : index
    %44 = memref.load %arg1[%c1_22, %c1_23] : memref<4x19xf32, #tpu.memory_space<smem>>
    %45 = vector.broadcast %44 : f32 to vector<8x128xf32>
    %46 = arith.mulf %45, %43 : vector<8x128xf32>
    %47 = arith.addf %42, %46 : vector<8x128xf32>
    %c1_24 = arith.constant 1 : index
    %c2_25 = arith.constant 2 : index
    %48 = memref.load %arg1[%c1_24, %c2_25] : memref<4x19xf32, #tpu.memory_space<smem>>
    %49 = vector.broadcast %48 : f32 to vector<8x128xf32>
    %50 = arith.mulf %49, %6 : vector<8x128xf32>
    %51 = arith.addf %47, %50 : vector<8x128xf32>
    %c127_i32_26 = arith.constant 127 : i32
    %52 = tpu.dynamic_rotate %6 by %c127_i32_26 dim 1 : vector<8x128xf32>, i32 -> vector<8x128xf32>
    %c1_27 = arith.constant 1 : index
    %c3_28 = arith.constant 3 : index
    %53 = memref.load %arg1[%c1_27, %c3_28] : memref<4x19xf32, #tpu.memory_space<smem>>
    %54 = vector.broadcast %53 : f32 to vector<8x128xf32>
    %55 = arith.mulf %54, %52 : vector<8x128xf32>
    %56 = arith.addf %51, %55 : vector<8x128xf32>
    %c126_i32_29 = arith.constant 126 : i32
    %57 = tpu.dynamic_rotate %6 by %c126_i32_29 dim 1 : vector<8x128xf32>, i32 -> vector<8x128xf32>
    %c1_30 = arith.constant 1 : index
    %c4_31 = arith.constant 4 : index
    %58 = memref.load %arg1[%c1_30, %c4_31] : memref<4x19xf32, #tpu.memory_space<smem>>
    %59 = vector.broadcast %58 : f32 to vector<8x128xf32>
    %60 = arith.mulf %59, %57 : vector<8x128xf32>
    %61 = arith.addf %56, %60 : vector<8x128xf32>
    %c1_32 = arith.constant 1 : index
    %c5_33 = arith.constant 5 : index
    %62 = memref.load %arg1[%c1_32, %c5_33] : memref<4x19xf32, #tpu.memory_space<smem>>
    %63 = vector.broadcast %62 : f32 to vector<8x128xf32>
    %64 = arith.addf %61, %63 : vector<8x128xf32>
    %cst_34 = arith.constant 0.000000e+00 : f32
    %65 = vector.broadcast %cst_34 : f32 to vector<8x128xf32>
    %66 = arith.select %2, %64, %65 : vector<8x128xi1>, vector<8x128xf32>
    %c2_i32_35 = arith.constant 2 : i32
    %67 = tpu.dynamic_rotate %8 by %c2_i32_35 dim 1 : vector<8x128xf32>, i32 -> vector<8x128xf32>
    %c2_36 = arith.constant 2 : index
    %c0_37 = arith.constant 0 : index
    %68 = memref.load %arg1[%c2_36, %c0_37] : memref<4x19xf32, #tpu.memory_space<smem>>
    %69 = vector.broadcast %68 : f32 to vector<8x128xf32>
    %70 = arith.mulf %69, %67 : vector<8x128xf32>
    %c1_i32_38 = arith.constant 1 : i32
    %71 = tpu.dynamic_rotate %8 by %c1_i32_38 dim 1 : vector<8x128xf32>, i32 -> vector<8x128xf32>
    %c2_39 = arith.constant 2 : index
    %c1_40 = arith.constant 1 : index
    %72 = memref.load %arg1[%c2_39, %c1_40] : memref<4x19xf32, #tpu.memory_space<smem>>
    %73 = vector.broadcast %72 : f32 to vector<8x128xf32>
    %74 = arith.mulf %73, %71 : vector<8x128xf32>
    %75 = arith.addf %70, %74 : vector<8x128xf32>
    %c2_41 = arith.constant 2 : index
    %c2_42 = arith.constant 2 : index
    %76 = memref.load %arg1[%c2_41, %c2_42] : memref<4x19xf32, #tpu.memory_space<smem>>
    %77 = vector.broadcast %76 : f32 to vector<8x128xf32>
    %78 = arith.mulf %77, %8 : vector<8x128xf32>
    %79 = arith.addf %75, %78 : vector<8x128xf32>
    %c127_i32_43 = arith.constant 127 : i32
    %80 = tpu.dynamic_rotate %8 by %c127_i32_43 dim 1 : vector<8x128xf32>, i32 -> vector<8x128xf32>
    %c2_44 = arith.constant 2 : index
    %c3_45 = arith.constant 3 : index
    %81 = memref.load %arg1[%c2_44, %c3_45] : memref<4x19xf32, #tpu.memory_space<smem>>
    %82 = vector.broadcast %81 : f32 to vector<8x128xf32>
    %83 = arith.mulf %82, %80 : vector<8x128xf32>
    %84 = arith.addf %79, %83 : vector<8x128xf32>
    %c126_i32_46 = arith.constant 126 : i32
    %85 = tpu.dynamic_rotate %8 by %c126_i32_46 dim 1 : vector<8x128xf32>, i32 -> vector<8x128xf32>
    %c2_47 = arith.constant 2 : index
    %c4_48 = arith.constant 4 : index
    %86 = memref.load %arg1[%c2_47, %c4_48] : memref<4x19xf32, #tpu.memory_space<smem>>
    %87 = vector.broadcast %86 : f32 to vector<8x128xf32>
    %88 = arith.mulf %87, %85 : vector<8x128xf32>
    %89 = arith.addf %84, %88 : vector<8x128xf32>
    %c2_49 = arith.constant 2 : index
    %c5_50 = arith.constant 5 : index
    %90 = memref.load %arg1[%c2_49, %c5_50] : memref<4x19xf32, #tpu.memory_space<smem>>
    %91 = vector.broadcast %90 : f32 to vector<8x128xf32>
    %92 = arith.addf %89, %91 : vector<8x128xf32>
    %cst_51 = arith.constant 0.000000e+00 : f32
    %93 = vector.broadcast %cst_51 : f32 to vector<8x128xf32>
    %94 = arith.select %2, %92, %93 : vector<8x128xi1>, vector<8x128xf32>
    %c2_i32_52 = arith.constant 2 : i32
    %95 = tpu.dynamic_rotate %10 by %c2_i32_52 dim 1 : vector<8x128xf32>, i32 -> vector<8x128xf32>
    %c3_53 = arith.constant 3 : index
    %c0_54 = arith.constant 0 : index
    %96 = memref.load %arg1[%c3_53, %c0_54] : memref<4x19xf32, #tpu.memory_space<smem>>
    %97 = vector.broadcast %96 : f32 to vector<8x128xf32>
    %98 = arith.mulf %97, %95 : vector<8x128xf32>
    %c1_i32_55 = arith.constant 1 : i32
    %99 = tpu.dynamic_rotate %10 by %c1_i32_55 dim 1 : vector<8x128xf32>, i32 -> vector<8x128xf32>
    %c3_56 = arith.constant 3 : index
    %c1_57 = arith.constant 1 : index
    %100 = memref.load %arg1[%c3_56, %c1_57] : memref<4x19xf32, #tpu.memory_space<smem>>
    %101 = vector.broadcast %100 : f32 to vector<8x128xf32>
    %102 = arith.mulf %101, %99 : vector<8x128xf32>
    %103 = arith.addf %98, %102 : vector<8x128xf32>
    %c3_58 = arith.constant 3 : index
    %c2_59 = arith.constant 2 : index
    %104 = memref.load %arg1[%c3_58, %c2_59] : memref<4x19xf32, #tpu.memory_space<smem>>
    %105 = vector.broadcast %104 : f32 to vector<8x128xf32>
    %106 = arith.mulf %105, %10 : vector<8x128xf32>
    %107 = arith.addf %103, %106 : vector<8x128xf32>
    %c127_i32_60 = arith.constant 127 : i32
    %108 = tpu.dynamic_rotate %10 by %c127_i32_60 dim 1 : vector<8x128xf32>, i32 -> vector<8x128xf32>
    %c3_61 = arith.constant 3 : index
    %c3_62 = arith.constant 3 : index
    %109 = memref.load %arg1[%c3_61, %c3_62] : memref<4x19xf32, #tpu.memory_space<smem>>
    %110 = vector.broadcast %109 : f32 to vector<8x128xf32>
    %111 = arith.mulf %110, %108 : vector<8x128xf32>
    %112 = arith.addf %107, %111 : vector<8x128xf32>
    %c126_i32_63 = arith.constant 126 : i32
    %113 = tpu.dynamic_rotate %10 by %c126_i32_63 dim 1 : vector<8x128xf32>, i32 -> vector<8x128xf32>
    %c3_64 = arith.constant 3 : index
    %c4_65 = arith.constant 4 : index
    %114 = memref.load %arg1[%c3_64, %c4_65] : memref<4x19xf32, #tpu.memory_space<smem>>
    %115 = vector.broadcast %114 : f32 to vector<8x128xf32>
    %116 = arith.mulf %115, %113 : vector<8x128xf32>
    %117 = arith.addf %112, %116 : vector<8x128xf32>
    %c3_66 = arith.constant 3 : index
    %c5_67 = arith.constant 5 : index
    %118 = memref.load %arg1[%c3_66, %c5_67] : memref<4x19xf32, #tpu.memory_space<smem>>
    %119 = vector.broadcast %118 : f32 to vector<8x128xf32>
    %120 = arith.addf %117, %119 : vector<8x128xf32>
    %cst_68 = arith.constant 0.000000e+00 : f32
    %121 = vector.broadcast %cst_68 : f32 to vector<8x128xf32>
    %122 = arith.select %2, %120, %121 : vector<8x128xi1>, vector<8x128xf32>
    %c9_i32 = arith.constant 9 : i32
    %123 = tpu.dynamic_rotate %38 by %c9_i32 dim 1 : vector<8x128xf32>, i32 -> vector<8x128xf32>
    %c0_69 = arith.constant 0 : index
    %c6 = arith.constant 6 : index
    %124 = memref.load %arg1[%c0_69, %c6] : memref<4x19xf32, #tpu.memory_space<smem>>
    %125 = vector.broadcast %124 : f32 to vector<8x128xf32>
    %126 = arith.mulf %125, %123 : vector<8x128xf32>
    %c6_i32 = arith.constant 6 : i32
    %127 = tpu.dynamic_rotate %38 by %c6_i32 dim 1 : vector<8x128xf32>, i32 -> vector<8x128xf32>
    %c0_70 = arith.constant 0 : index
    %c7 = arith.constant 7 : index
    %128 = memref.load %arg1[%c0_70, %c7] : memref<4x19xf32, #tpu.memory_space<smem>>
    %129 = vector.broadcast %128 : f32 to vector<8x128xf32>
    %130 = arith.mulf %129, %127 : vector<8x128xf32>
    %131 = arith.addf %126, %130 : vector<8x128xf32>
    %c3_i32 = arith.constant 3 : i32
    %132 = tpu.dynamic_rotate %38 by %c3_i32 dim 1 : vector<8x128xf32>, i32 -> vector<8x128xf32>
    %c0_71 = arith.constant 0 : index
    %c8 = arith.constant 8 : index
    %133 = memref.load %arg1[%c0_71, %c8] : memref<4x19xf32, #tpu.memory_space<smem>>
    %134 = vector.broadcast %133 : f32 to vector<8x128xf32>
    %135 = arith.mulf %134, %132 : vector<8x128xf32>
    %136 = arith.addf %131, %135 : vector<8x128xf32>
    %c0_72 = arith.constant 0 : index
    %c9 = arith.constant 9 : index
    %137 = memref.load %arg1[%c0_72, %c9] : memref<4x19xf32, #tpu.memory_space<smem>>
    %138 = vector.broadcast %137 : f32 to vector<8x128xf32>
    %139 = arith.mulf %138, %38 : vector<8x128xf32>
    %140 = arith.addf %136, %139 : vector<8x128xf32>
    %c125_i32 = arith.constant 125 : i32
    %141 = tpu.dynamic_rotate %38 by %c125_i32 dim 1 : vector<8x128xf32>, i32 -> vector<8x128xf32>
    %c0_73 = arith.constant 0 : index
    %c10 = arith.constant 10 : index
    %142 = memref.load %arg1[%c0_73, %c10] : memref<4x19xf32, #tpu.memory_space<smem>>
    %143 = vector.broadcast %142 : f32 to vector<8x128xf32>
    %144 = arith.mulf %143, %141 : vector<8x128xf32>
    %145 = arith.addf %140, %144 : vector<8x128xf32>
    %c122_i32 = arith.constant 122 : i32
    %146 = tpu.dynamic_rotate %38 by %c122_i32 dim 1 : vector<8x128xf32>, i32 -> vector<8x128xf32>
    %c0_74 = arith.constant 0 : index
    %c11 = arith.constant 11 : index
    %147 = memref.load %arg1[%c0_74, %c11] : memref<4x19xf32, #tpu.memory_space<smem>>
    %148 = vector.broadcast %147 : f32 to vector<8x128xf32>
    %149 = arith.mulf %148, %146 : vector<8x128xf32>
    %150 = arith.addf %145, %149 : vector<8x128xf32>
    %c119_i32 = arith.constant 119 : i32
    %151 = tpu.dynamic_rotate %38 by %c119_i32 dim 1 : vector<8x128xf32>, i32 -> vector<8x128xf32>
    %c0_75 = arith.constant 0 : index
    %c12 = arith.constant 12 : index
    %152 = memref.load %arg1[%c0_75, %c12] : memref<4x19xf32, #tpu.memory_space<smem>>
    %153 = vector.broadcast %152 : f32 to vector<8x128xf32>
    %154 = arith.mulf %153, %151 : vector<8x128xf32>
    %155 = arith.addf %150, %154 : vector<8x128xf32>
    %c0_76 = arith.constant 0 : index
    %c13 = arith.constant 13 : index
    %156 = memref.load %arg1[%c0_76, %c13] : memref<4x19xf32, #tpu.memory_space<smem>>
    %157 = vector.broadcast %156 : f32 to vector<8x128xf32>
    %158 = arith.addf %155, %157 : vector<8x128xf32>
    %c9_i32_77 = arith.constant 9 : i32
    %159 = tpu.dynamic_rotate %66 by %c9_i32_77 dim 1 : vector<8x128xf32>, i32 -> vector<8x128xf32>
    %c1_78 = arith.constant 1 : index
    %c6_79 = arith.constant 6 : index
    %160 = memref.load %arg1[%c1_78, %c6_79] : memref<4x19xf32, #tpu.memory_space<smem>>
    %161 = vector.broadcast %160 : f32 to vector<8x128xf32>
    %162 = arith.mulf %161, %159 : vector<8x128xf32>
    %c6_i32_80 = arith.constant 6 : i32
    %163 = tpu.dynamic_rotate %66 by %c6_i32_80 dim 1 : vector<8x128xf32>, i32 -> vector<8x128xf32>
    %c1_81 = arith.constant 1 : index
    %c7_82 = arith.constant 7 : index
    %164 = memref.load %arg1[%c1_81, %c7_82] : memref<4x19xf32, #tpu.memory_space<smem>>
    %165 = vector.broadcast %164 : f32 to vector<8x128xf32>
    %166 = arith.mulf %165, %163 : vector<8x128xf32>
    %167 = arith.addf %162, %166 : vector<8x128xf32>
    %c3_i32_83 = arith.constant 3 : i32
    %168 = tpu.dynamic_rotate %66 by %c3_i32_83 dim 1 : vector<8x128xf32>, i32 -> vector<8x128xf32>
    %c1_84 = arith.constant 1 : index
    %c8_85 = arith.constant 8 : index
    %169 = memref.load %arg1[%c1_84, %c8_85] : memref<4x19xf32, #tpu.memory_space<smem>>
    %170 = vector.broadcast %169 : f32 to vector<8x128xf32>
    %171 = arith.mulf %170, %168 : vector<8x128xf32>
    %172 = arith.addf %167, %171 : vector<8x128xf32>
    %c1_86 = arith.constant 1 : index
    %c9_87 = arith.constant 9 : index
    %173 = memref.load %arg1[%c1_86, %c9_87] : memref<4x19xf32, #tpu.memory_space<smem>>
    %174 = vector.broadcast %173 : f32 to vector<8x128xf32>
    %175 = arith.mulf %174, %66 : vector<8x128xf32>
    %176 = arith.addf %172, %175 : vector<8x128xf32>
    %c125_i32_88 = arith.constant 125 : i32
    %177 = tpu.dynamic_rotate %66 by %c125_i32_88 dim 1 : vector<8x128xf32>, i32 -> vector<8x128xf32>
    %c1_89 = arith.constant 1 : index
    %c10_90 = arith.constant 10 : index
    %178 = memref.load %arg1[%c1_89, %c10_90] : memref<4x19xf32, #tpu.memory_space<smem>>
    %179 = vector.broadcast %178 : f32 to vector<8x128xf32>
    %180 = arith.mulf %179, %177 : vector<8x128xf32>
    %181 = arith.addf %176, %180 : vector<8x128xf32>
    %c122_i32_91 = arith.constant 122 : i32
    %182 = tpu.dynamic_rotate %66 by %c122_i32_91 dim 1 : vector<8x128xf32>, i32 -> vector<8x128xf32>
    %c1_92 = arith.constant 1 : index
    %c11_93 = arith.constant 11 : index
    %183 = memref.load %arg1[%c1_92, %c11_93] : memref<4x19xf32, #tpu.memory_space<smem>>
    %184 = vector.broadcast %183 : f32 to vector<8x128xf32>
    %185 = arith.mulf %184, %182 : vector<8x128xf32>
    %186 = arith.addf %181, %185 : vector<8x128xf32>
    %c119_i32_94 = arith.constant 119 : i32
    %187 = tpu.dynamic_rotate %66 by %c119_i32_94 dim 1 : vector<8x128xf32>, i32 -> vector<8x128xf32>
    %c1_95 = arith.constant 1 : index
    %c12_96 = arith.constant 12 : index
    %188 = memref.load %arg1[%c1_95, %c12_96] : memref<4x19xf32, #tpu.memory_space<smem>>
    %189 = vector.broadcast %188 : f32 to vector<8x128xf32>
    %190 = arith.mulf %189, %187 : vector<8x128xf32>
    %191 = arith.addf %186, %190 : vector<8x128xf32>
    %c1_97 = arith.constant 1 : index
    %c13_98 = arith.constant 13 : index
    %192 = memref.load %arg1[%c1_97, %c13_98] : memref<4x19xf32, #tpu.memory_space<smem>>
    %193 = vector.broadcast %192 : f32 to vector<8x128xf32>
    %194 = arith.addf %191, %193 : vector<8x128xf32>
    %c9_i32_99 = arith.constant 9 : i32
    %195 = tpu.dynamic_rotate %94 by %c9_i32_99 dim 1 : vector<8x128xf32>, i32 -> vector<8x128xf32>
    %c2_100 = arith.constant 2 : index
    %c6_101 = arith.constant 6 : index
    %196 = memref.load %arg1[%c2_100, %c6_101] : memref<4x19xf32, #tpu.memory_space<smem>>
    %197 = vector.broadcast %196 : f32 to vector<8x128xf32>
    %198 = arith.mulf %197, %195 : vector<8x128xf32>
    %c6_i32_102 = arith.constant 6 : i32
    %199 = tpu.dynamic_rotate %94 by %c6_i32_102 dim 1 : vector<8x128xf32>, i32 -> vector<8x128xf32>
    %c2_103 = arith.constant 2 : index
    %c7_104 = arith.constant 7 : index
    %200 = memref.load %arg1[%c2_103, %c7_104] : memref<4x19xf32, #tpu.memory_space<smem>>
    %201 = vector.broadcast %200 : f32 to vector<8x128xf32>
    %202 = arith.mulf %201, %199 : vector<8x128xf32>
    %203 = arith.addf %198, %202 : vector<8x128xf32>
    %c3_i32_105 = arith.constant 3 : i32
    %204 = tpu.dynamic_rotate %94 by %c3_i32_105 dim 1 : vector<8x128xf32>, i32 -> vector<8x128xf32>
    %c2_106 = arith.constant 2 : index
    %c8_107 = arith.constant 8 : index
    %205 = memref.load %arg1[%c2_106, %c8_107] : memref<4x19xf32, #tpu.memory_space<smem>>
    %206 = vector.broadcast %205 : f32 to vector<8x128xf32>
    %207 = arith.mulf %206, %204 : vector<8x128xf32>
    %208 = arith.addf %203, %207 : vector<8x128xf32>
    %c2_108 = arith.constant 2 : index
    %c9_109 = arith.constant 9 : index
    %209 = memref.load %arg1[%c2_108, %c9_109] : memref<4x19xf32, #tpu.memory_space<smem>>
    %210 = vector.broadcast %209 : f32 to vector<8x128xf32>
    %211 = arith.mulf %210, %94 : vector<8x128xf32>
    %212 = arith.addf %208, %211 : vector<8x128xf32>
    %c125_i32_110 = arith.constant 125 : i32
    %213 = tpu.dynamic_rotate %94 by %c125_i32_110 dim 1 : vector<8x128xf32>, i32 -> vector<8x128xf32>
    %c2_111 = arith.constant 2 : index
    %c10_112 = arith.constant 10 : index
    %214 = memref.load %arg1[%c2_111, %c10_112] : memref<4x19xf32, #tpu.memory_space<smem>>
    %215 = vector.broadcast %214 : f32 to vector<8x128xf32>
    %216 = arith.mulf %215, %213 : vector<8x128xf32>
    %217 = arith.addf %212, %216 : vector<8x128xf32>
    %c122_i32_113 = arith.constant 122 : i32
    %218 = tpu.dynamic_rotate %94 by %c122_i32_113 dim 1 : vector<8x128xf32>, i32 -> vector<8x128xf32>
    %c2_114 = arith.constant 2 : index
    %c11_115 = arith.constant 11 : index
    %219 = memref.load %arg1[%c2_114, %c11_115] : memref<4x19xf32, #tpu.memory_space<smem>>
    %220 = vector.broadcast %219 : f32 to vector<8x128xf32>
    %221 = arith.mulf %220, %218 : vector<8x128xf32>
    %222 = arith.addf %217, %221 : vector<8x128xf32>
    %c119_i32_116 = arith.constant 119 : i32
    %223 = tpu.dynamic_rotate %94 by %c119_i32_116 dim 1 : vector<8x128xf32>, i32 -> vector<8x128xf32>
    %c2_117 = arith.constant 2 : index
    %c12_118 = arith.constant 12 : index
    %224 = memref.load %arg1[%c2_117, %c12_118] : memref<4x19xf32, #tpu.memory_space<smem>>
    %225 = vector.broadcast %224 : f32 to vector<8x128xf32>
    %226 = arith.mulf %225, %223 : vector<8x128xf32>
    %227 = arith.addf %222, %226 : vector<8x128xf32>
    %c2_119 = arith.constant 2 : index
    %c13_120 = arith.constant 13 : index
    %228 = memref.load %arg1[%c2_119, %c13_120] : memref<4x19xf32, #tpu.memory_space<smem>>
    %229 = vector.broadcast %228 : f32 to vector<8x128xf32>
    %230 = arith.addf %227, %229 : vector<8x128xf32>
    %c9_i32_121 = arith.constant 9 : i32
    %231 = tpu.dynamic_rotate %122 by %c9_i32_121 dim 1 : vector<8x128xf32>, i32 -> vector<8x128xf32>
    %c3_122 = arith.constant 3 : index
    %c6_123 = arith.constant 6 : index
    %232 = memref.load %arg1[%c3_122, %c6_123] : memref<4x19xf32, #tpu.memory_space<smem>>
    %233 = vector.broadcast %232 : f32 to vector<8x128xf32>
    %234 = arith.mulf %233, %231 : vector<8x128xf32>
    %c6_i32_124 = arith.constant 6 : i32
    %235 = tpu.dynamic_rotate %122 by %c6_i32_124 dim 1 : vector<8x128xf32>, i32 -> vector<8x128xf32>
    %c3_125 = arith.constant 3 : index
    %c7_126 = arith.constant 7 : index
    %236 = memref.load %arg1[%c3_125, %c7_126] : memref<4x19xf32, #tpu.memory_space<smem>>
    %237 = vector.broadcast %236 : f32 to vector<8x128xf32>
    %238 = arith.mulf %237, %235 : vector<8x128xf32>
    %239 = arith.addf %234, %238 : vector<8x128xf32>
    %c3_i32_127 = arith.constant 3 : i32
    %240 = tpu.dynamic_rotate %122 by %c3_i32_127 dim 1 : vector<8x128xf32>, i32 -> vector<8x128xf32>
    %c3_128 = arith.constant 3 : index
    %c8_129 = arith.constant 8 : index
    %241 = memref.load %arg1[%c3_128, %c8_129] : memref<4x19xf32, #tpu.memory_space<smem>>
    %242 = vector.broadcast %241 : f32 to vector<8x128xf32>
    %243 = arith.mulf %242, %240 : vector<8x128xf32>
    %244 = arith.addf %239, %243 : vector<8x128xf32>
    %c3_130 = arith.constant 3 : index
    %c9_131 = arith.constant 9 : index
    %245 = memref.load %arg1[%c3_130, %c9_131] : memref<4x19xf32, #tpu.memory_space<smem>>
    %246 = vector.broadcast %245 : f32 to vector<8x128xf32>
    %247 = arith.mulf %246, %122 : vector<8x128xf32>
    %248 = arith.addf %244, %247 : vector<8x128xf32>
    %c125_i32_132 = arith.constant 125 : i32
    %249 = tpu.dynamic_rotate %122 by %c125_i32_132 dim 1 : vector<8x128xf32>, i32 -> vector<8x128xf32>
    %c3_133 = arith.constant 3 : index
    %c10_134 = arith.constant 10 : index
    %250 = memref.load %arg1[%c3_133, %c10_134] : memref<4x19xf32, #tpu.memory_space<smem>>
    %251 = vector.broadcast %250 : f32 to vector<8x128xf32>
    %252 = arith.mulf %251, %249 : vector<8x128xf32>
    %253 = arith.addf %248, %252 : vector<8x128xf32>
    %c122_i32_135 = arith.constant 122 : i32
    %254 = tpu.dynamic_rotate %122 by %c122_i32_135 dim 1 : vector<8x128xf32>, i32 -> vector<8x128xf32>
    %c3_136 = arith.constant 3 : index
    %c11_137 = arith.constant 11 : index
    %255 = memref.load %arg1[%c3_136, %c11_137] : memref<4x19xf32, #tpu.memory_space<smem>>
    %256 = vector.broadcast %255 : f32 to vector<8x128xf32>
    %257 = arith.mulf %256, %254 : vector<8x128xf32>
    %258 = arith.addf %253, %257 : vector<8x128xf32>
    %c119_i32_138 = arith.constant 119 : i32
    %259 = tpu.dynamic_rotate %122 by %c119_i32_138 dim 1 : vector<8x128xf32>, i32 -> vector<8x128xf32>
    %c3_139 = arith.constant 3 : index
    %c12_140 = arith.constant 12 : index
    %260 = memref.load %arg1[%c3_139, %c12_140] : memref<4x19xf32, #tpu.memory_space<smem>>
    %261 = vector.broadcast %260 : f32 to vector<8x128xf32>
    %262 = arith.mulf %261, %259 : vector<8x128xf32>
    %263 = arith.addf %258, %262 : vector<8x128xf32>
    %c3_141 = arith.constant 3 : index
    %c13_142 = arith.constant 13 : index
    %264 = memref.load %arg1[%c3_141, %c13_142] : memref<4x19xf32, #tpu.memory_space<smem>>
    %265 = vector.broadcast %264 : f32 to vector<8x128xf32>
    %266 = arith.addf %263, %265 : vector<8x128xf32>
    %c0_143 = arith.constant 0 : index
    %c14 = arith.constant 14 : index
    %267 = memref.load %arg1[%c0_143, %c14] : memref<4x19xf32, #tpu.memory_space<smem>>
    %268 = vector.broadcast %267 : f32 to vector<8x128xf32>
    %269 = arith.mulf %268, %158 : vector<8x128xf32>
    %c0_144 = arith.constant 0 : index
    %c15 = arith.constant 15 : index
    %270 = memref.load %arg1[%c0_144, %c15] : memref<4x19xf32, #tpu.memory_space<smem>>
    %271 = vector.broadcast %270 : f32 to vector<8x128xf32>
    %272 = arith.mulf %271, %194 : vector<8x128xf32>
    %273 = arith.addf %269, %272 : vector<8x128xf32>
    %c0_145 = arith.constant 0 : index
    %c16 = arith.constant 16 : index
    %274 = memref.load %arg1[%c0_145, %c16] : memref<4x19xf32, #tpu.memory_space<smem>>
    %275 = vector.broadcast %274 : f32 to vector<8x128xf32>
    %276 = arith.mulf %275, %230 : vector<8x128xf32>
    %277 = arith.addf %273, %276 : vector<8x128xf32>
    %c0_146 = arith.constant 0 : index
    %c17 = arith.constant 17 : index
    %278 = memref.load %arg1[%c0_146, %c17] : memref<4x19xf32, #tpu.memory_space<smem>>
    %279 = vector.broadcast %278 : f32 to vector<8x128xf32>
    %280 = arith.mulf %279, %266 : vector<8x128xf32>
    %281 = arith.addf %277, %280 : vector<8x128xf32>
    %c0_147 = arith.constant 0 : index
    %c18 = arith.constant 18 : index
    %282 = memref.load %arg1[%c0_147, %c18] : memref<4x19xf32, #tpu.memory_space<smem>>
    %283 = vector.broadcast %282 : f32 to vector<8x128xf32>
    %284 = arith.addf %281, %283 : vector<8x128xf32>
    %285 = arith.mulf %4, %284 : vector<8x128xf32>
    %c0_148 = arith.constant 0 : index
    %c0_149 = arith.constant 0 : index
    %c0_150 = arith.constant 0 : index
    %286 = vector.load %arg3[%c0_148, %c0_149, %c0_150] : memref<4x8x128xf32, #tpu.memory_space<vmem>>, vector<1x8x128xf32>
    %287 = vector.shape_cast %286 : vector<1x8x128xf32> to vector<8x128xf32>
    %288 = vector.shape_cast %285 : vector<8x128xf32> to vector<1x8x128xf32>
    tpu.vector_store %arg3[%c0_148, %c0_149, %c0_150], %288 {strides = array<i32>} : memref<4x8x128xf32, #tpu.memory_space<vmem>>, vector<1x8x128xf32>,
    %c1_151 = arith.constant 1 : index
    %c14_152 = arith.constant 14 : index
    %289 = memref.load %arg1[%c1_151, %c14_152] : memref<4x19xf32, #tpu.memory_space<smem>>
    %290 = vector.broadcast %289 : f32 to vector<8x128xf32>
    %291 = arith.mulf %290, %158 : vector<8x128xf32>
    %c1_153 = arith.constant 1 : index
    %c15_154 = arith.constant 15 : index
    %292 = memref.load %arg1[%c1_153, %c15_154] : memref<4x19xf32, #tpu.memory_space<smem>>
    %293 = vector.broadcast %292 : f32 to vector<8x128xf32>
    %294 = arith.mulf %293, %194 : vector<8x128xf32>
    %295 = arith.addf %291, %294 : vector<8x128xf32>
    %c1_155 = arith.constant 1 : index
    %c16_156 = arith.constant 16 : index
    %296 = memref.load %arg1[%c1_155, %c16_156] : memref<4x19xf32, #tpu.memory_space<smem>>
    %297 = vector.broadcast %296 : f32 to vector<8x128xf32>
    %298 = arith.mulf %297, %230 : vector<8x128xf32>
    %299 = arith.addf %295, %298 : vector<8x128xf32>
    %c1_157 = arith.constant 1 : index
    %c17_158 = arith.constant 17 : index
    %300 = memref.load %arg1[%c1_157, %c17_158] : memref<4x19xf32, #tpu.memory_space<smem>>
    %301 = vector.broadcast %300 : f32 to vector<8x128xf32>
    %302 = arith.mulf %301, %266 : vector<8x128xf32>
    %303 = arith.addf %299, %302 : vector<8x128xf32>
    %c1_159 = arith.constant 1 : index
    %c18_160 = arith.constant 18 : index
    %304 = memref.load %arg1[%c1_159, %c18_160] : memref<4x19xf32, #tpu.memory_space<smem>>
    %305 = vector.broadcast %304 : f32 to vector<8x128xf32>
    %306 = arith.addf %303, %305 : vector<8x128xf32>
    %307 = arith.mulf %6, %306 : vector<8x128xf32>
    %c1_161 = arith.constant 1 : index
    %c0_162 = arith.constant 0 : index
    %c0_163 = arith.constant 0 : index
    %308 = vector.load %arg3[%c1_161, %c0_162, %c0_163] : memref<4x8x128xf32, #tpu.memory_space<vmem>>, vector<1x8x128xf32>
    %309 = vector.shape_cast %308 : vector<1x8x128xf32> to vector<8x128xf32>
    %310 = vector.shape_cast %307 : vector<8x128xf32> to vector<1x8x128xf32>
    tpu.vector_store %arg3[%c1_161, %c0_162, %c0_163], %310 {strides = array<i32>} : memref<4x8x128xf32, #tpu.memory_space<vmem>>, vector<1x8x128xf32>,
    %c2_164 = arith.constant 2 : index
    %c14_165 = arith.constant 14 : index
    %311 = memref.load %arg1[%c2_164, %c14_165] : memref<4x19xf32, #tpu.memory_space<smem>>
    %312 = vector.broadcast %311 : f32 to vector<8x128xf32>
    %313 = arith.mulf %312, %158 : vector<8x128xf32>
    %c2_166 = arith.constant 2 : index
    %c15_167 = arith.constant 15 : index
    %314 = memref.load %arg1[%c2_166, %c15_167] : memref<4x19xf32, #tpu.memory_space<smem>>
    %315 = vector.broadcast %314 : f32 to vector<8x128xf32>
    %316 = arith.mulf %315, %194 : vector<8x128xf32>
    %317 = arith.addf %313, %316 : vector<8x128xf32>
    %c2_168 = arith.constant 2 : index
    %c16_169 = arith.constant 16 : index
    %318 = memref.load %arg1[%c2_168, %c16_169] : memref<4x19xf32, #tpu.memory_space<smem>>
    %319 = vector.broadcast %318 : f32 to vector<8x128xf32>
    %320 = arith.mulf %319, %230 : vector<8x128xf32>
    %321 = arith.addf %317, %320 : vector<8x128xf32>
    %c2_170 = arith.constant 2 : index
    %c17_171 = arith.constant 17 : index
    %322 = memref.load %arg1[%c2_170, %c17_171] : memref<4x19xf32, #tpu.memory_space<smem>>
    %323 = vector.broadcast %322 : f32 to vector<8x128xf32>
    %324 = arith.mulf %323, %266 : vector<8x128xf32>
    %325 = arith.addf %321, %324 : vector<8x128xf32>
    %c2_172 = arith.constant 2 : index
    %c18_173 = arith.constant 18 : index
    %326 = memref.load %arg1[%c2_172, %c18_173] : memref<4x19xf32, #tpu.memory_space<smem>>
    %327 = vector.broadcast %326 : f32 to vector<8x128xf32>
    %328 = arith.addf %325, %327 : vector<8x128xf32>
    %329 = arith.mulf %8, %328 : vector<8x128xf32>
    %c2_174 = arith.constant 2 : index
    %c0_175 = arith.constant 0 : index
    %c0_176 = arith.constant 0 : index
    %330 = vector.load %arg3[%c2_174, %c0_175, %c0_176] : memref<4x8x128xf32, #tpu.memory_space<vmem>>, vector<1x8x128xf32>
    %331 = vector.shape_cast %330 : vector<1x8x128xf32> to vector<8x128xf32>
    %332 = vector.shape_cast %329 : vector<8x128xf32> to vector<1x8x128xf32>
    tpu.vector_store %arg3[%c2_174, %c0_175, %c0_176], %332 {strides = array<i32>} : memref<4x8x128xf32, #tpu.memory_space<vmem>>, vector<1x8x128xf32>,
    %c3_177 = arith.constant 3 : index
    %c14_178 = arith.constant 14 : index
    %333 = memref.load %arg1[%c3_177, %c14_178] : memref<4x19xf32, #tpu.memory_space<smem>>
    %334 = vector.broadcast %333 : f32 to vector<8x128xf32>
    %335 = arith.mulf %334, %158 : vector<8x128xf32>
    %c3_179 = arith.constant 3 : index
    %c15_180 = arith.constant 15 : index
    %336 = memref.load %arg1[%c3_179, %c15_180] : memref<4x19xf32, #tpu.memory_space<smem>>
    %337 = vector.broadcast %336 : f32 to vector<8x128xf32>
    %338 = arith.mulf %337, %194 : vector<8x128xf32>
    %339 = arith.addf %335, %338 : vector<8x128xf32>
    %c3_181 = arith.constant 3 : index
    %c16_182 = arith.constant 16 : index
    %340 = memref.load %arg1[%c3_181, %c16_182] : memref<4x19xf32, #tpu.memory_space<smem>>
    %341 = vector.broadcast %340 : f32 to vector<8x128xf32>
    %342 = arith.mulf %341, %230 : vector<8x128xf32>
    %343 = arith.addf %339, %342 : vector<8x128xf32>
    %c3_183 = arith.constant 3 : index
    %c17_184 = arith.constant 17 : index
    %344 = memref.load %arg1[%c3_183, %c17_184] : memref<4x19xf32, #tpu.memory_space<smem>>
    %345 = vector.broadcast %344 : f32 to vector<8x128xf32>
    %346 = arith.mulf %345, %266 : vector<8x128xf32>
    %347 = arith.addf %343, %346 : vector<8x128xf32>
    %c3_185 = arith.constant 3 : index
    %c18_186 = arith.constant 18 : index
    %348 = memref.load %arg1[%c3_185, %c18_186] : memref<4x19xf32, #tpu.memory_space<smem>>
    %349 = vector.broadcast %348 : f32 to vector<8x128xf32>
    %350 = arith.addf %347, %349 : vector<8x128xf32>
    %351 = arith.mulf %10, %350 : vector<8x128xf32>
    %c3_187 = arith.constant 3 : index
    %c0_188 = arith.constant 0 : index
    %c0_189 = arith.constant 0 : index
    %352 = vector.load %arg3[%c3_187, %c0_188, %c0_189] : memref<4x8x128xf32, #tpu.memory_space<vmem>>, vector<1x8x128xf32>
    %353 = vector.shape_cast %352 : vector<1x8x128xf32> to vector<8x128xf32>
    %354 = vector.shape_cast %351 : vector<8x128xf32> to vector<1x8x128xf32>
    tpu.vector_store %arg3[%c3_187, %c0_188, %c0_189], %354 {strides = array<i32>} : memref<4x8x128xf32, #tpu.memory_space<vmem>>, vector<1x8x128xf32>,
    return
  }
  func.func @transform_0(%arg0: i32) -> (i32, i32) {
    %c0_i32 = arith.constant 0 : i32
    %c0_i32_0 = arith.constant 0 : i32
    %c0_i32_1 = arith.constant 0 : i32
    return %c0_i32, %c0_i32_0 : i32, i32
  }
  func.func @transform_1(%arg0: i32) -> (i32, i32, i32) {
    %c0_i32 = arith.constant 0 : i32
    %c0_i32_0 = arith.constant 0 : i32
    %c0_i32_1 = arith.constant 0 : i32
    return %c0_i32, %arg0, %c0_i32_0 : i32, i32, i32
  }
  func.func @transform_2(%arg0: i32) -> (i32, i32, i32) {
    %c0_i32 = arith.constant 0 : i32
    %c0_i32_0 = arith.constant 0 : i32
    %c0_i32_1 = arith.constant 0 : i32
    return %c0_i32, %arg0, %c0_i32_0 : i32, i32, i32
  }
}

</mosaic_0001>

<bundles_post_ra>
// kernel: ddca_forward.1
= control target key start
LH: loop header
LB: loop body
LE: loop exit
PB: predicated region body
PF: predicated region fallthrough
CT: control target
= control target key end

     0   :  { %7 = vsyncpa [#allocation3], 0  ;;  %s520_s12 = smov [#allocation2]   ;;  %s880_s0 = inlined_call_operand.vmem [shape: f32[4,19], index: 0, kind: input, shape index: {}]   ;;  %s881_s1 = inlined_call_operand.vmem [shape: f32[4,8,128], index: 1, kind: input, shape index: {}]   ;;  %s882_s2 = inlined_call_operand.vmem [shape: f32[4,8,128], index: 2, kind: output, shape index: {}]  }
   0x1   :  { %s13_s11 = sshll.u32 %s880_s0, 4  ;;  %s14_s11 = int_to_ptr.vmem [resolvable:$true] %s13_s11 }
   0x2   :  { %16 = dma.vmem_to_smem %s14_s11, 64, %s520_s12, [#allocation3]  }
   0x3   :  { %518 = dma.done.wait [#allocation3], 64  }
   0x4   :  { %519 = vsyncadd [#allocation3], 4294967232 }
   0x5   :  { %23 = sfence }
   0x6   :  { %v552_v0 = vld [vmem:[%s881_s1 + $0x8] sm:$0xff]  ;;  %v557_v1 = vld [vmem:[%s881_s1] sm:$0xff]  ;;  %v562_v2 = vld [vmem:[%s881_s1 + $0x10] sm:$0xff]  ;;  %s521_s0 = smov 2   ;;  %s522_s19 = smov 1   ;;  %v24_v23 = vlaneseq }
   0x7   :  { %65 = vrot.lane.b32.xlu1 %v552_v0, %s521_s0  ;;  %34 = vrot.lane.b32.xlu0 %v557_v1, %s521_s0  ;;  %s523_s20 = smov 127   ;;  %v575_v3 = vld [vmem:[%s881_s1 + $0x18] sm:$0xff]  ;;  %s524_s23 = smov 126  }
   0x8   :  { %96 = vrot.lane.b32.xlu2 %v562_v2, %s521_s0  ;;  %s423_s1 = sld [smem:[#allocation2 + $0x81]]  ;;  %v606_v33 = vand.u32 127, %v24_v23  ;;  %s525_s14 = smov 9  }
   0x9   :  { %s422_s24 = sld [smem:[#allocation2 + $0x80]]  ;;  %s526_s18 = smov 6  }
   0xa   :  { %s424_s25 = sld [smem:[#allocation2 + $0x82]]  ;;  %vm26_vm0 = vcmp.lt.s32.totalorder %v606_v33, 16  ;;  %s528_s21 = smov 125  }
   0xb   :  { %s36_s26 = sld [smem:[#allocation2]]  ;;  %s529_s22 = smov 122  }
   0xc   :  { %s417_s27 = sld [smem:[#allocation2 + $0x1]] }
   0xd   :  { %s425_s28 = sld [smem:[#allocation2 + $0x83]] }
   0xe   :  { %v73_v9 = vstv %s423_s1  ;;  %s426_s29 = sld [smem:[#allocation2 + $0x84]] }
   0xf   :  { %70 = vrot.lane.b32.xlu1 %v552_v0, %s522_s19  ;;  %39 = vrot.lane.b32.xlu0 %v557_v1, %s522_s19  ;;  %v68_v10 = vstv %s422_s24  ;;  %s589_s30 = sld [smem:[#allocation2 + $0x2]] }
  0x10   :  { %101 = vrot.lane.b32.xlu2 %v562_v2, %s522_s19  ;;  %v77_v14 = vstv %s424_s25  ;;  %s591_s3 = sld [smem:[#allocation2 + $0x3]] }
  0x11   :  { %s593_s4 = sld [smem:[#allocation2 + $0x100]]  ;;  %v78_v18 = vmul.f32 %v552_v0, %v77_v14  ;;  %v37_v19 = vstv %s36_s26 }
  0x12   :  { %v42_v16 = vstv %s417_s27  ;;  %s595_s5 = sld [smem:[#allocation2 + $0x85]] }
  0x13   :  { %s597_s6 = sld [smem:[#allocation2 + $0x101]]  ;;  %v83_v20 = vstv %s425_s28 }
  0x14   :  { %v89_v21 = vstv %s426_s29  ;;  %s600_s7 = sld [smem:[#allocation2 + $0x4]] }
  0x15   :  { %v46_v26 = vstv %s589_s30  ;;  %s603_s8 = sld [smem:[#allocation2 + $0x5]] }
  0x16   :  { %v52_v32 = vstv %s591_s3  ;;  %s608_s9 = sld [smem:[#allocation2 + $0x102]]  ;;  %v47_v36 = vmul.f32 %v46_v26, %v557_v1 }
  0x17   :  { %80 = vrot.lane.b32.xlu1 %v552_v0, %s523_s20  ;;  %49 = vrot.lane.b32.xlu0 %v557_v1, %s523_s20  ;;  %s612_s10 = sld [smem:[#allocation2 + $0x181]]  ;;  %v99_v38 = vstv %s593_s4 }
  0x18   :  { %127 = vrot.lane.b32.xlu2 %v575_v3, %s521_s0  ;;  %v93_v37 = vstv %s595_s5  ;;  %s615_s11 = sld [smem:[#allocation2 + $0x103]] }
  0x19   :  { %v104_v41 = vstv %s597_s6  ;;  %s620_s12 = sld [smem:[#allocation2 + $0x104]] }
  0x1a   :  { %v58_v42 = vstv %s600_s7  ;;  %s622_s13 = sld [smem:[#allocation2 + $0x180]] }
  0x1b   :  { %v62_v52 = vstv %s603_s8  ;;  %s436_s15 = sld [smem:[#allocation2 + $0x182]] }
  0x1c   :  { %v108_v53 = vstv %s608_s9  ;;  %s633_s16 = sld [smem:[#allocation2 + $0x105]] }
  0x1d   :  { %v109_v57 = vmul.f32 %v562_v2, %v108_v53  ;;  %v135_v58 = vstv %s612_s10  ;;  %s637_s17 = sld [smem:[#allocation2 + $0x183]] }
  0x1e   :  { %v114_v59 = vstv %s615_s11  ;;  %s438_s0 = sld [smem:[#allocation2 + $0x184]] }
  0x1f   :  { %55 = vrot.lane.b32.xlu1 %v557_v1, %s524_s23  ;;  %132 = vrot.lane.b32.xlu0 %v575_v3, %s522_s19  ;;  %v120_v60 = vstv %s620_s12  ;;  %s527_s19 = smov 3   ;;  %s696_s1 = sld [smem:[#allocation2 + $0x9]] }
  0x20   :  { %86 = vrot.lane.b32.xlu2 %v552_v0, %s524_s23  ;;  %v130_v62 = vstv %s622_s13  ;;  %s698_s24 = sld [smem:[#allocation2 + $0x109]] }
  0x21   :  { %s704_s25 = sld [smem:[#allocation2 + $0x89]] }
  0x22   :  { %s706_s26 = sld [smem:[#allocation2 + $0x189]] }
  0x23   :  { %s441_s27 = sld [smem:[#allocation2 + $0x7]] }
  0x24   :  { %s708_s28 = sld [smem:[#allocation2 + $0x8]] }
  0x25   :  { %s710_s29 = sld [smem:[#allocation2 + $0x107]] }
  0x26   :  { %s712_s30 = sld [smem:[#allocation2 + $0x86]] }
  0x27   :  { %111 = vrot.lane.b32.xlu0 %v562_v2, %s523_s20  ;;  %117 = vrot.lane.b32.xlu1 %v562_v2, %s524_s23  ;;  %s440_s3 = sld [smem:[#allocation2 + $0x6]] }
  0x28   :  { %142 = vrot.lane.b32.xlu2 %v575_v3, %s523_s20  ;;  %s439_s20 = sld [smem:[#allocation2 + $0x185]] }
  0x29   :  { %s714_s4 = sld [smem:[#allocation2 + $0x187]] }
  0x2a   :  { %s716_s5 = sld [smem:[#allocation2 + $0x88]] }
  0x2b   :  { %s718_s6 = sld [smem:[#allocation2 + $0x188]] }
  0x2c   :  { %s449_s7 = sld [smem:[#allocation2 + $0x87]]  ;;  %v203_v53 = vstv %s712_s30 }
  0x2d   :  { %s722_s8 = sld [smem:[#allocation2 + $0x108]] }
  0x2e   :  { %s724_s9 = sld [smem:[#allocation2 + $0x10a]] }
  0x2f   :  { %148 = vrot.lane.b32.xlu0 %v575_v3, %s524_s23  ;;  %s530_s23 = smov 119   ;;  %s726_s10 = sld [smem:[#allocation2 + $0x106]] }
  0x30   :  { %s728_s11 = sld [smem:[#allocation2 + $0xa]] }
  0x31   :  { %s730_s12 = sld [smem:[#allocation2 + $0x10b]] }
  0x32   :  { %s732_s13 = sld [smem:[#allocation2 + $0x186]] }
  0x33   :  { %s798_s30 = sld [smem:[#allocation2 + $0x18f]] }
  0x62   :  { %v97_v4 = vpop.permute.xlu2 %96 }
  0x63   :  { %v100_v45 = vmul.f32 %v99_v38, %v97_v4 }
  0x6a   :  { %v585_v5 = vpop.permute.xlu2 %101 }
  0x6b   :  { %v105_v48 = vmul.f32 %v104_v41, %v585_v5 }
  0x6d   :  { %v106_v55 = vadd.f32 %v105_v48, %v100_v45  ;;  %v172_v48 = vstv %s708_s28  ;;  %s786_s28 = sld [smem:[#allocation2 + $0x8f]] }
  0x72   :  { %v587_v8 = vpop.permute.xlu2 %127 }
  0x79   :  { %v66_v6 = vpop.permute.xlu1 %65  ;;  %v35_v7 = vpop.permute.xlu0 %34 }
  0x7a   :  { %v69_v15 = vmul.f32 %v68_v10, %v66_v6  ;;  %v87_v22 = vpop.permute.xlu2 %86  ;;  %v38_v28 = vmul.f32 %v37_v19, %v35_v7  ;;  %v110_v6 = vadd.f32 %v109_v57, %v106_v55  ;;  %v139_v10 = vstv %s436_s15  ;;  %s736_s15 = sld [smem:[#allocation2 + $0x18b]] }
  0x7b   :  { %v90_v31 = vmul.f32 %v89_v21, %v87_v22  ;;  %v245_v57 = vstv %s726_s10  ;;  %s835_s10 = sld [smem:[#allocation2 + $0x110]] }
  0x81   :  { %v71_v11 = vpop.permute.xlu1 %70  ;;  %v40_v12 = vpop.permute.xlu0 %39 }
  0x82   :  { %v74_v13 = vmul.f32 %v73_v9, %v71_v11  ;;  %v43_v24 = vmul.f32 %v42_v16, %v40_v12  ;;  %v131_v11 = vmul.f32 %v130_v62, %v587_v8  ;;  %v250_v62 = vstv %s710_s29  ;;  %s794_s29 = sld [smem:[#allocation2 + $0x18c]] }
  0x84   :  { %v75_v17 = vadd.f32 %v74_v13, %v69_v15  ;;  %v44_v34 = vadd.f32 %v43_v24, %v38_v28  ;;  %v124_v13 = vstv %s633_s16  ;;  %v140_v15 = vmul.f32 %v575_v3, %v139_v10  ;;  %s738_s16 = sld [smem:[#allocation2 + $0x8a]] }
  0x85   :  { %v292_v10 = vstv %s714_s4  ;;  %s811_s4 = sld [smem:[#allocation2 + $0x91]] }
  0x86   :  { %v79_v29 = vadd.f32 %v78_v18, %v75_v17  ;;  %v48_v43 = vadd.f32 %v47_v36, %v44_v34  ;;  %v145_v17 = vstv %s637_s17  ;;  %v143_v18 = vpop.permute.xlu2 %142  ;;  %s743_s17 = sld [smem:[#allocation2 + $0xc]] }
  0x87   :  { %v146_v8 = vmul.f32 %v145_v17, %v143_v18 }
  0x89   :  { %v81_v25 = vpop.permute.xlu1 %80  ;;  %v50_v27 = vpop.permute.xlu0 %49 }
  0x8a   :  { %v84_v30 = vmul.f32 %v83_v20, %v81_v25  ;;  %v53_v39 = vmul.f32 %v52_v32, %v50_v27  ;;  %v151_v20 = vstv %s438_s0  ;;  %v155_v27 = vstv %s439_s20  ;;  %s748_s0 = sld [smem:[#allocation2 + $0xe]] }
  0x8b   :  { %s755_s20 = sld [smem:[#allocation2 + $0x8b]] }
  0x8c   :  { %v85_v35 = vadd.f32 %v84_v30, %v79_v29  ;;  %v54_v49 = vadd.f32 %v53_v39, %v48_v43  ;;  %v194_v17 = vstv %s743_s17 }
  0x8e   :  { %v91_v40 = vadd.f32 %v90_v31, %v85_v35 }
  0x90   :  { %v94_v44 = vadd.f32 %v93_v37, %v91_v40 }
  0x91   :  { %v56_v46 = vpop.permute.xlu1 %55  ;;  %v133_v47 = vpop.permute.xlu0 %132 }
  0x92   :  { %v627_v50 = vsel %vm26_vm0, %v94_v44, 0.0  ;;  %v59_v51 = vmul.f32 %v58_v42, %v56_v46  ;;  %v136_v5 = vmul.f32 %v135_v58, %v133_v47  ;;  %v161_v42 = vstv %s440_s3  ;;  %s801_s3 = sld [smem:[#allocation2 + $0x18d]] }
  0x93   :  { %200 = vrot.lane.b32.xlu0 %v627_v50, %s525_s14  ;;  %v166_v44 = vstv %s441_s27  ;;  %v176_v58 = vstv %s696_s1  ;;  %s772_s1 = sld [smem:[#allocation2 + $0x8c]] }
  0x94   :  { %v60_v54 = vadd.f32 %v59_v51, %v54_v49  ;;  %v137_v14 = vadd.f32 %v136_v5, %v131_v11  ;;  %v208_v49 = vstv %s449_s7  ;;  %v287_v5 = vstv %s732_s13  ;;  %s776_s27 = sld [smem:[#allocation2 + $0x8d]] }
  0x95   :  { %s823_s7 = sld [smem:[#allocation2 + $0x10d]] }
  0x96   :  { %v63_v56 = vadd.f32 %v62_v52, %v60_v54  ;;  %v141_v22 = vadd.f32 %v140_v15, %v137_v14  ;;  %s842_s13 = sld [smem:[#allocation2 + $0x12]] }
  0x98   :  { %v643_v61 = vsel %vm26_vm0, %v63_v56, 0.0  ;;  %v147_v25 = vadd.f32 %v146_v8, %v141_v22  ;;  %v260_v8 = vstv %s698_s24  ;;  %s790_s24 = sld [smem:[#allocation2 + $0x10f]] }
  0x99   :  { %v112_v63 = vpop.permute.xlu0 %111  ;;  %163 = vrot.lane.b32.xlu2 %v643_v61, %s526_s18  ;;  %158 = vrot.lane.b32.xlu1 %v643_v61, %s525_s14  ;;  %v118_v4 = vpop.permute.xlu1 %117 }
  0x9a   :  { %v115_v7 = vmul.f32 %v114_v59, %v112_v63  ;;  %v121_v9 = vmul.f32 %v120_v60, %v118_v4  ;;  %v182_v59 = vstv %s728_s11  ;;  %s837_s11 = sld [smem:[#allocation2 + $0x190]] }
  0x9b   :  { %211 = vrot.lane.b32.xlu0 %v627_v50, %s527_s19 }
  0x9c   :  { %v116_v12 = vadd.f32 %v115_v7, %v110_v6  ;;  %v214_v6 = vstv %s716_s5  ;;  %s815_s5 = sld [smem:[#allocation2 + $0x10c]] }
  0x9e   :  { %v122_v16 = vadd.f32 %v121_v9, %v116_v12  ;;  %v177_v12 = vmul.f32 %v176_v58, %v643_v61 }
  0xa0   :  { %v125_v19 = vadd.f32 %v124_v13, %v122_v16  ;;  %v218_v16 = vstv %s704_s25  ;;  %s783_s25 = sld [smem:[#allocation2 + $0xf]] }
  0xa1   :  { %v149_v21 = vpop.permute.xlu0 %148  ;;  %169 = vrot.lane.b32.xlu2 %v643_v61, %s527_s19  ;;  %205 = vrot.lane.b32.xlu1 %v627_v50, %s526_s18 }
  0xa2   :  { %v662_v23 = vsel %vm26_vm0, %v125_v19, 0.0  ;;  %v152_v24 = vmul.f32 %v151_v20, %v149_v21  ;;  %v256_v19 = vstv %s722_s8  ;;  %s828_s8 = sld [smem:[#allocation2 + $0x10]] }
  0xa3   :  { %253 = vrot.lane.b32.xlu0 %v662_v23, %s527_s19 }
  0xa4   :  { %v153_v26 = vadd.f32 %v152_v24, %v147_v25  ;;  %v224_v25 = vstv %s738_s16  ;;  %s850_s16 = sld [smem:[#allocation2 + $0x192]] }
  0xa6   :  { %v156_v28 = vadd.f32 %v155_v27, %v153_v26  ;;  %v298_v27 = vstv %s718_s6  ;;  %s818_s6 = sld [smem:[#allocation2 + $0x111]] }
  0xa8   :  { %v673_v29 = vsel %vm26_vm0, %v156_v28, 0.0 }
  0xa9   :  { %247 = vrot.lane.b32.xlu2 %v662_v23, %s526_s18  ;;  %242 = vrot.lane.b32.xlu1 %v662_v23, %s525_s14 }
  0xab   :  { %179 = vrot.lane.b32.xlu0 %v643_v61, %s528_s21 }
  0xb1   :  { %289 = vrot.lane.b32.xlu2 %v673_v29, %s526_s18  ;;  %284 = vrot.lane.b32.xlu1 %v673_v29, %s525_s14  ;;  %s734_s14 = sld [smem:[#allocation2 + $0xb]] }
  0xb2   :  { %s745_s18 = sld [smem:[#allocation2 + $0xd]] }
  0xb3   :  { %185 = vrot.lane.b32.xlu0 %v643_v61, %s529_s22 }
  0xb7   :  { %v188_v9 = vstv %s734_s14  ;;  %s844_s14 = sld [smem:[#allocation2 + $0x92]] }
  0xb9   :  { %295 = vrot.lane.b32.xlu2 %v673_v29, %s527_s19  ;;  %221 = vrot.lane.b32.xlu1 %v627_v50, %s528_s21  ;;  %s751_s19 = sld [smem:[#allocation2 + $0x8e]] }
  0xbb   :  { %191 = vrot.lane.b32.xlu0 %v643_v61, %s530_s23 }
  0xc1   :  { %263 = vrot.lane.b32.xlu2 %v662_v23, %s528_s21  ;;  %227 = vrot.lane.b32.xlu1 %v627_v50, %s529_s22 }
  0xc3   :  { %305 = vrot.lane.b32.xlu0 %v673_v29, %s528_s21  ;;  %s759_s21 = sld [smem:[#allocation2 + $0x10e]] }
  0xc9   :  { %269 = vrot.lane.b32.xlu2 %v662_v23, %s529_s22  ;;  %233 = vrot.lane.b32.xlu1 %v627_v50, %s530_s23 }
  0xcb   :  { %317 = vrot.lane.b32.xlu0 %v673_v29, %s530_s23 }
  0xd1   :  { %311 = vrot.lane.b32.xlu2 %v673_v29, %s529_s22  ;;  %275 = vrot.lane.b32.xlu1 %v662_v23, %s530_s23  ;;  %s763_s22 = sld [smem:[#allocation2 + $0x18e]] }
  0xd2   :  { %s767_s23 = sld [smem:[#allocation2 + $0x18a]] }
  0xf3   :  { %v164_v30 = vpop.permute.xlu2 %163 }
  0xf4   :  { %v167_v47 = vmul.f32 %v166_v44, %v164_v30 }
  0xfb   :  { %v170_v31 = vpop.permute.xlu2 %169 }
  0xfc   :  { %v173_v55 = vmul.f32 %v172_v48, %v170_v31  ;;  %v198_v48 = vstv %s745_s18 }
 0x103   :  { %v692_v33 = vpop.permute.xlu2 %247 }
 0x104   :  { %v251_v14 = vmul.f32 %v250_v62, %v692_v33 }
 0x105   :  { %v201_v32 = vpop.permute.xlu0 %200 }
 0x106   :  { %v204_v63 = vmul.f32 %v203_v53, %v201_v32  ;;  %v314_v53 = vstv %s736_s15  ;;  %s847_s15 = sld [smem:[#allocation2 + $0x112]] }
 0x10b   :  { %v159_v34 = vpop.permute.xlu1 %158  ;;  %v700_v37 = vpop.permute.xlu2 %289 }
 0x10c   :  { %v162_v46 = vmul.f32 %v161_v42, %v159_v34  ;;  %v293_v61 = vmul.f32 %v292_v10, %v700_v37  ;;  %v230_v34 = vstv %s755_s20  ;;  %v219_v37 = vmul.f32 %v218_v16, %v627_v50 }
 0x10d   :  { %v694_v35 = vpop.permute.xlu0 %211  ;;  %v330_v10 = vstv %s783_s25 }
 0x10e   :  { %v168_v52 = vadd.f32 %v167_v47, %v162_v46  ;;  %v215_v18 = vmul.f32 %v214_v6, %v694_v35  ;;  %v308_v46 = vstv %s767_s23  ;;  %v389_v6 = vstv %s763_s22 }
 0x110   :  { %v174_v4 = vadd.f32 %v173_v55, %v168_v52  ;;  %v266_v52 = vstv %s724_s9  ;;  %s832_s9 = sld [smem:[#allocation2 + $0x90]] }
 0x112   :  { %v178_v20 = vadd.f32 %v177_v12, %v174_v4 }
 0x113   :  { %v206_v36 = vpop.permute.xlu1 %205  ;;  %v720_v41 = vpop.permute.xlu2 %295 }
 0x114   :  { %v209_v56 = vmul.f32 %v208_v49, %v206_v36  ;;  %v299_v42 = vmul.f32 %v298_v27, %v720_v41  ;;  %v236_v41 = vstv %s772_s1 }
 0x115   :  { %v702_v38 = vpop.permute.xlu0 %253 }
 0x116   :  { %v210_v11 = vadd.f32 %v209_v56, %v204_v63  ;;  %v257_v32 = vmul.f32 %v256_v19, %v702_v38  ;;  %v327_v56 = vstv %s748_s0 }
 0x118   :  { %v216_v28 = vadd.f32 %v215_v18, %v210_v11  ;;  %v350_v11 = vstv %s786_s28  ;;  %v392_v18 = vstv %s798_s30 }
 0x11a   :  { %v220_v44 = vadd.f32 %v219_v37, %v216_v28 }
 0x11b   :  { %v243_v39 = vpop.permute.xlu1 %242  ;;  %v741_v51 = vpop.permute.xlu2 %263 }
 0x11c   :  { %v246_v7 = vmul.f32 %v245_v57, %v243_v39  ;;  %v347_v57 = vstv %s751_s19  ;;  %v267_v4 = vmul.f32 %v266_v52, %v741_v51 }
 0x11d   :  { %v180_v40 = vpop.permute.xlu0 %179 }
 0x11e   :  { %v183_v13 = vmul.f32 %v182_v59, %v180_v40  ;;  %v252_v22 = vadd.f32 %v251_v14, %v246_v7  ;;  %v302_v40 = vstv %s706_s26  ;;  %s806_s26 = sld [smem:[#allocation2 + $0x11]] }
 0x11f   :  { %v303_v49 = vmul.f32 %v302_v40, %v673_v29  ;;  %v368_v29 = vstv %s759_s21  ;;  %v324_v40 = vstv %s801_s3 }
 0x120   :  { %v184_v30 = vadd.f32 %v183_v13, %v178_v20  ;;  %v258_v38 = vadd.f32 %v257_v32, %v252_v22  ;;  %v320_v13 = vstv %s794_s29 }
 0x123   :  { %v285_v43 = vpop.permute.xlu1 %284  ;;  %v780_v24 = vpop.permute.xlu2 %269 }
 0x124   :  { %v288_v15 = vmul.f32 %v287_v5, %v285_v43  ;;  %v261_v43 = vmul.f32 %v260_v8, %v662_v23  ;;  %v272_v23 = vstv %s730_s12  ;;  %s839_s12 = sld [smem:[#allocation2 + $0x191]] }
 0x125   :  { %v186_v45 = vpop.permute.xlu0 %185  ;;  %v273_v51 = vmul.f32 %v272_v23, %v780_v24 }
 0x126   :  { %v189_v21 = vmul.f32 %v188_v9, %v186_v45  ;;  %v294_v33 = vadd.f32 %v293_v61, %v288_v15  ;;  %v262_v55 = vadd.f32 %v261_v43, %v258_v38  ;;  %v240_v9 = vstv %s776_s27 }
 0x127   :  { %v282_v38 = vstv %s823_s7  ;;  %v338_v43 = vstv %s806_s26 }
 0x128   :  { %v190_v36 = vadd.f32 %v189_v21, %v184_v30  ;;  %v300_v47 = vadd.f32 %v299_v42, %v294_v33  ;;  %v268_v15 = vadd.f32 %v267_v4, %v262_v55 }
 0x12a   :  { %v304_v7 = vadd.f32 %v303_v49, %v300_v47  ;;  %v375_v47 = vstv %s835_s10  ;;  %v358_v49 = vstv %s811_s4  ;;  %v400_v52 = vstv %s839_s12 }
 0x12b   :  { %v222_v54 = vpop.permute.xlu1 %221  ;;  %v312_v5 = vpop.permute.xlu2 %311 }
 0x12c   :  { %v225_v39 = vmul.f32 %v224_v25, %v222_v54  ;;  %v315_v19 = vmul.f32 %v314_v53, %v312_v5  ;;  %v342_v5 = vstv %s842_s13 }
 0x12d   :  { %v192_v60 = vpop.permute.xlu0 %191 }
 0x12e   :  { %v195_v31 = vmul.f32 %v194_v17, %v192_v60  ;;  %v226_v54 = vadd.f32 %v225_v39, %v220_v44  ;;  %v371_v17 = vstv %s790_s24  ;;  %v274_v39 = vadd.f32 %v273_v51, %v268_v15 }
 0x12f   :  { %v334_v44 = vstv %s828_s8 }
 0x130   :  { %v196_v45 = vadd.f32 %v195_v31, %v190_v36  ;;  %v278_v31 = vstv %s815_s5 }
 0x132   :  { %v199_v60 = vadd.f32 %v198_v48, %v196_v45  ;;  %v396_v48 = vstv %s837_s11 }
 0x133   :  { %v228_v26 = vpop.permute.xlu1 %227 }
 0x134   :  { %v231_v50 = vmul.f32 %v230_v34, %v228_v26  ;;  %v328_v20 = vmul.f32 %v327_v56, %v199_v60  ;;  %v348_v61 = vmul.f32 %v347_v57, %v199_v60  ;;  %v369_v22 = vmul.f32 %v368_v29, %v199_v60 }
 0x135   :  { %v306_v35 = vpop.permute.xlu0 %305  ;;  %v390_v8 = vmul.f32 %v389_v6, %v199_v60  ;;  %v362_v6 = vstv %s844_s14 }
 0x136   :  { %v309_v58 = vmul.f32 %v308_v46, %v306_v35  ;;  %v232_v62 = vadd.f32 %v231_v50, %v226_v54  ;;  %v354_v46 = vstv %s832_s9 }
 0x138   :  { %v310_v16 = vadd.f32 %v309_v58, %v304_v7  ;;  %v383_v7 = vstv %s847_s15 }
 0x13a   :  { %v316_v24 = vadd.f32 %v315_v19, %v310_v16 }
 0x13b   :  { %v234_v59 = vpop.permute.xlu1 %233 }
 0x13c   :  { %v237_v63 = vmul.f32 %v236_v41, %v234_v59  ;;  %v379_v41 = vstv %s818_s6 }
 0x13d   :  { %v318_v14 = vpop.permute.xlu0 %317 }
 0x13e   :  { %v238_v12 = vadd.f32 %v237_v63, %v232_v62  ;;  %v321_v25 = vmul.f32 %v320_v13, %v318_v14 }
 0x140   :  { %v241_v21 = vadd.f32 %v240_v9, %v238_v12  ;;  %v322_v37 = vadd.f32 %v321_v25, %v316_v24  ;;  %v404_v9 = vstv %s850_s16 }
 0x142   :  { %v331_v26 = vmul.f32 %v330_v10, %v241_v21  ;;  %v351_v27 = vmul.f32 %v350_v11, %v241_v21  ;;  %v372_v28 = vmul.f32 %v371_v17, %v241_v21  ;;  %v393_v30 = vmul.f32 %v392_v18, %v241_v21 }
 0x143   :  { %v276_v32 = vpop.permute.xlu1 %275  ;;  %v325_v50 = vadd.f32 %v324_v40, %v322_v37 }
 0x144   :  { %v332_v33 = vadd.f32 %v331_v26, %v328_v20  ;;  %v352_v34 = vadd.f32 %v351_v27, %v348_v61  ;;  %v373_v35 = vadd.f32 %v372_v28, %v369_v22  ;;  %v394_v36 = vadd.f32 %v393_v30, %v390_v8 }
 0x145   :  { %v279_v42 = vmul.f32 %v278_v31, %v276_v32  ;;  %v339_v57 = vmul.f32 %v338_v43, %v325_v50  ;;  %v359_v58 = vmul.f32 %v358_v49, %v325_v50  ;;  %v380_v59 = vmul.f32 %v379_v41, %v325_v50 }
 0x146   :  { %v401_v29 = vmul.f32 %v400_v52, %v325_v50 }
 0x147   :  { %v280_v45 = vadd.f32 %v279_v42, %v274_v39 }
 0x149   :  { %v283_v23 = vadd.f32 %v282_v38, %v280_v45 }
 0x14b   :  { %v335_v53 = vmul.f32 %v334_v44, %v283_v23  ;;  %v355_v54 = vmul.f32 %v354_v46, %v283_v23  ;;  %v376_v55 = vmul.f32 %v375_v47, %v283_v23  ;;  %v397_v56 = vmul.f32 %v396_v48, %v283_v23 }
 0x14d   :  { %v336_v60 = vadd.f32 %v335_v53, %v332_v33  ;;  %v356_v62 = vadd.f32 %v355_v54, %v352_v34  ;;  %v377_v63 = vadd.f32 %v376_v55, %v373_v35  ;;  %v398_v4 = vadd.f32 %v397_v56, %v394_v36 }
 0x14f   :  { %v340_v10 = vadd.f32 %v339_v57, %v336_v60  ;;  %v360_v11 = vadd.f32 %v359_v58, %v356_v62  ;;  %v381_v12 = vadd.f32 %v380_v59, %v377_v63  ;;  %v402_v13 = vadd.f32 %v401_v29, %v398_v4 }
 0x151   :  { %v343_v14 = vadd.f32 %v342_v5, %v340_v10  ;;  %v363_v15 = vadd.f32 %v362_v6, %v360_v11  ;;  %v384_v16 = vadd.f32 %v383_v7, %v381_v12  ;;  %v405_v17 = vadd.f32 %v404_v9, %v402_v13 }
 0x153   :  { %v344_v18 = vmul.f32 %v343_v14, %v557_v1  ;;  %v364_v51 = vmul.f32 %v552_v0, %v363_v15  ;;  %v385_v19 = vmul.f32 %v562_v2, %v384_v16  ;;  %v406_v20 = vmul.f32 %v575_v3, %v405_v17 }
 0x155   :  { %345 = vst [vmem:[%s882_s2] sm:$0xff] %v344_v18 }
 0x156   :  { %482 = vst [vmem:[%s882_s2 + $0x8] sm:$0xff] %v364_v51 }
 0x157   :  { %488 = vst [vmem:[%s882_s2 + $0x10] sm:$0xff] %v385_v19 }
 0x158   :  { %494 = vst [vmem:[%s882_s2 + $0x18] sm:$0xff] %v406_v20 }
 0x159   :  { %413 = vsyncpa [#allocation3], 1 }

</bundles_post_ra>
